<compile_context>
chip_gen: v6e
topology: v6e:2x2x1
jax: 0.10.0
libtpu: 0.0.40
codegen_flags: <defaults>
</compile_context>

<pallas_src>
import math

import jax
import jax.numpy as jnp
from jax.experimental import pallas as pl
from jax.experimental.pallas import tpu as pltpu


def _mlp_kernel(x_ref, w1_ref, b1_ref, w2_ref, b2_ref, o_ref):
    # x_ref:  (tm, D_in)    w1_ref: (D_in, H)    b1_ref: (1, H)
    # w2_ref: (H, D_out)    b2_ref: (1, D_out)   o_ref:  (tm, D_out)
    x = x_ref[...]
    h = jnp.dot(x, w1_ref[...], preferred_element_type=jnp.float32)
    h = h + b1_ref[...].astype(jnp.float32)
    # PyTorch nn.GELU defaults to the exact erf form; the tanh approximation
    # is used here because it lowers cleanly on Mosaic (EUP tanh), matching
    # to ~1e-3.
    # TODO(synk): switch to exact erf GELU once erf lowering is guaranteed.
    h = jax.nn.gelu(h, approximate=True)
    y = jnp.dot(h.astype(w2_ref.dtype), w2_ref[...],
                preferred_element_type=jnp.float32)
    y = y + b2_ref[...].astype(jnp.float32)
    o_ref[...] = y.astype(o_ref.dtype)


def mlp_forward(x, w1, b1, w2, b2, *, block_rows=256, dropout=0.0,
                training=False, key=None):
    """Fused Mlp forward: gelu(x @ w1 + b1) @ w2 + b2, then dropout."""
    orig_leading = x.shape[:-1]
    d_in, hidden = w1.shape
    d_out = w2.shape[1]
    assert x.shape[-1] == d_in

    # Flatten tokens to a 2-D row slab (lane-dense last dim).
    x2d = x.reshape(-1, d_in)
    m = x2d.shape[0]

    # Row block: multiple of 8 (or the full extent for tiny inputs); capped
    # so the per-step VMEM footprint stays small on all generations.
    tm = m if m <= block_rows else block_rows
    m_pad = pl.cdiv(m, tm) * tm
    if m_pad != m:
        # Pad so every block is full -> unmasked stores, no partial tiles.
        x2d = jnp.pad(x2d, ((0, m_pad - m), (0, 0)))
    grid = (m_pad // tm,)

    b1_2d = b1.reshape(1, hidden)
    b2_2d = b2.reshape(1, d_out)

    itemsize = jnp.dtype(x.dtype).itemsize
    cost = pl.CostEstimate(
        flops=2 * m_pad * d_in * hidden + 2 * m_pad * hidden * d_out,
        transcendentals=m_pad * hidden,
        bytes_accessed=(m_pad * d_in + d_in * hidden + hidden
                        + hidden * d_out + d_out + m_pad * d_out) * itemsize,
    )

    out = pl.pallas_call(
        _mlp_kernel,
        out_shape=jax.ShapeDtypeStruct((m_pad, d_out), x.dtype),
        grid=grid,
        in_specs=[
            pl.BlockSpec((tm, d_in), lambda i: (i, 0)),
            pl.BlockSpec((d_in, hidden), lambda i: (0, 0)),   # resident
            pl.BlockSpec((1, hidden), lambda i: (0, 0)),      # resident
            pl.BlockSpec((hidden, d_out), lambda i: (0, 0)),  # resident
            pl.BlockSpec((1, d_out), lambda i: (0, 0)),       # resident
        ],
        out_specs=pl.BlockSpec((tm, d_out), lambda i: (i, 0)),
        compiler_params=pltpu.CompilerParams(
            dimension_semantics=("parallel",)),
        cost_estimate=cost,
    )(x2d, w1, b1_2d, w2, b2_2d)

    if m_pad != m:
        out = out[:m]
    out = out.reshape(orig_leading + (d_out,))

    if dropout > 0.0 and training:
        # Inverted dropout matching torch.nn.Dropout semantics (plain JAX;
        # identity in eval mode / at the default p=0.0).
        keep = 1.0 - dropout
        mask = jax.random.bernoulli(key, keep, out.shape)
        out = jnp.where(mask, out / keep, jnp.zeros_like(out)).astype(out.dtype)
    return out


class Mlp:
    """Forward-pass mirror of the PyTorch Mlp module (fc1 -> GELU -> fc2 -> drop)."""

    def __init__(self, in_features, hidden_features, out_features,
                 dropout=0.0, *, key, dtype=jnp.float32):
        k1, k2, k3, k4 = jax.random.split(key, 4)
        # torch.nn.Linear default init: U(-1/sqrt(fan_in), 1/sqrt(fan_in)).
        lim1 = 1.0 / math.sqrt(in_features)
        lim2 = 1.0 / math.sqrt(hidden_features)
        # Weights stored as (in, out) = transposed torch layout, so the
        # kernel computes x @ W directly.
        self.w1 = jax.random.uniform(k1, (in_features, hidden_features),
                                     dtype, -lim1, lim1)
        self.b1 = jax.random.uniform(k2, (hidden_features,), dtype, -lim1, lim1)
        self.w2 = jax.random.uniform(k3, (hidden_features, out_features),
                                     dtype, -lim2, lim2)
        self.b2 = jax.random.uniform(k4, (out_features,), dtype, -lim2, lim2)
        self.dropout = dropout
        self.training = False

    def __call__(self, x, *, key=None):
        return mlp_forward(x, self.w1, self.b1, self.w2, self.b2,
                           dropout=self.dropout, training=self.training,
                           key=key)


if __name__ == "__main__":
    key = jax.random.PRNGKey(0)
    kx, kp = jax.random.split(key)

    # Small ViT-like token layout: batch=2, seq=8, in=32, hidden=64, out=32.
    B, N, D_IN, H, D_OUT = 2, 8, 32, 64, 32
    x = jax.random.normal(kx, (B, N, D_IN), dtype=jnp.float32)

    mlp = Mlp(D_IN, H, D_OUT, dropout=0.0, key=kp)
    out = jax.block_until_ready(mlp(x))

    # Pure-JAX reference of the same forward pass.
    ref = x.reshape(-1, D_IN) @ mlp.w1 + mlp.b1
    ref = jax.nn.gelu(ref, approximate=True)
    ref = ref @ mlp.w2 + mlp.b2
    ref = ref.reshape(B, N, D_OUT)

    assert out.shape == (B, N, D_OUT)
    assert jnp.allclose(out, ref, atol=1e-5, rtol=1e-5), "mismatch vs reference"

    print("KERNEL_OK")
</pallas_src>

<mosaic_0001>
module attributes {stable_mosaic.version = 11 : i64} {
  func.func @_mlp_kernel(%arg0: i32, %arg1: memref<16x32xf32, #tpu.memory_space<vmem>>, %arg2: memref<32x64xf32, #tpu.memory_space<vmem>>, %arg3: memref<1x64xf32, #tpu.memory_space<vmem>>, %arg4: memref<64x32xf32, #tpu.memory_space<vmem>>, %arg5: memref<1x32xf32, #tpu.memory_space<vmem>>, %arg6: memref<16x32xf32, #tpu.memory_space<vmem>>) attributes {dimension_semantics = [#tpu.dimension_semantics<parallel>], iteration_bounds = array<i64: 1>, scalar_prefetch = 0 : i64, scratch_operands = 0 : i64, tpu.core_type = #tpu.core_type<tc>, window_params = [{transform_indices = @transform_0, window_bounds = array<i64: 16, 32>}, {pipeline_mode = #tpu.pipeline_mode<synchronous>, transform_indices = @transform_1, window_bounds = array<i64: 32, 64>}, {pipeline_mode = #tpu.pipeline_mode<synchronous>, transform_indices = @transform_2, window_bounds = array<i64: 1, 64>}, {pipeline_mode = #tpu.pipeline_mode<synchronous>, transform_indices = @transform_3, window_bounds = array<i64: 64, 32>}, {pipeline_mode = #tpu.pipeline_mode<synchronous>, transform_indices = @transform_4, window_bounds = array<i64: 1, 32>}, {transform_indices = @transform_5, window_bounds = array<i64: 16, 32>}]} {
    %c0 = arith.constant 0 : index
    %c0_0 = arith.constant 0 : index
    %0 = vector.load %arg1[%c0, %c0_0] : memref<16x32xf32, #tpu.memory_space<vmem>>, vector<16x32xf32>
    %c0_1 = arith.constant 0 : index
    %c0_2 = arith.constant 0 : index
    %1 = vector.load %arg2[%c0_1, %c0_2] : memref<32x64xf32, #tpu.memory_space<vmem>>, vector<32x64xf32>
    %cst = arith.constant dense<0.000000e+00> : vector<16x64xf32>
    %2 = tpu.matmul %0, %1, %cst {dimension_numbers = #tpu.dot_dimension_numbers<[1], [0], [0], [1], [0, 0, 1, 1], [], []>} : vector<16x32xf32>, vector<32x64xf32>, vector<16x64xf32> -> vector<16x64xf32>
    %c0_3 = arith.constant 0 : index
    %c0_4 = arith.constant 0 : index
    %3 = vector.load %arg3[%c0_3, %c0_4] : memref<1x64xf32, #tpu.memory_space<vmem>>, vector<1x64xf32>
    %4 = vector.broadcast %3 : vector<1x64xf32> to vector<16x64xf32>
    %5 = arith.addf %2, %4 : vector<16x64xf32>
    %6 = arith.mulf %5, %5 : vector<16x64xf32>
    %7 = arith.mulf %5, %6 : vector<16x64xf32>
    %cst_5 = arith.constant 4.471500e-02 : f32
    %8 = vector.broadcast %cst_5 : f32 to vector<16x64xf32>
    %9 = arith.mulf %8, %7 : vector<16x64xf32>
    %10 = arith.addf %5, %9 : vector<16x64xf32>
    %cst_6 = arith.constant 0.797884583 : f32
    %11 = vector.broadcast %cst_6 : f32 to vector<16x64xf32>
    %12 = arith.mulf %11, %10 : vector<16x64xf32>
    %13 = math.tanh %12 : vector<16x64xf32>
    %cst_7 = arith.constant 1.000000e+00 : f32
    %14 = vector.broadcast %cst_7 : f32 to vector<16x64xf32>
    %15 = arith.addf %14, %13 : vector<16x64xf32>
    %cst_8 = arith.constant 5.000000e-01 : f32
    %16 = vector.broadcast %cst_8 : f32 to vector<16x64xf32>
    %17 = arith.mulf %16, %15 : vector<16x64xf32>
    %18 = arith.mulf %5, %17 : vector<16x64xf32>
    %c0_9 = arith.constant 0 : index
    %c0_10 = arith.constant 0 : index
    %19 = vector.load %arg4[%c0_9, %c0_10] : memref<64x32xf32, #tpu.memory_space<vmem>>, vector<64x32xf32>
    %cst_11 = arith.constant dense<0.000000e+00> : vector<16x32xf32>
    %20 = tpu.matmul %18, %19, %cst_11 {dimension_numbers = #tpu.dot_dimension_numbers<[1], [0], [0], [1], [0, 0, 1, 1], [], []>} : vector<16x64xf32>, vector<64x32xf32>, vector<16x32xf32> -> vector<16x32xf32>
    %c0_12 = arith.constant 0 : index
    %c0_13 = arith.constant 0 : index
    %21 = vector.load %arg5[%c0_12, %c0_13] : memref<1x32xf32, #tpu.memory_space<vmem>>, vector<1x32xf32>
    %22 = vector.broadcast %21 : vector<1x32xf32> to vector<16x32xf32>
    %23 = arith.addf %20, %22 : vector<16x32xf32>
    %c0_14 = arith.constant 0 : index
    %c0_15 = arith.constant 0 : index
    %24 = vector.load %arg6[%c0_14, %c0_15] : memref<16x32xf32, #tpu.memory_space<vmem>>, vector<16x32xf32>
    tpu.vector_store %arg6[%c0_14, %c0_15], %23 {strides = array<i32>} : memref<16x32xf32, #tpu.memory_space<vmem>>, vector<16x32xf32>,
    return
  }
  func.func @transform_0(%arg0: i32) -> (i32, i32) {
    %c0_i32 = arith.constant 0 : i32
    %c0_i32_0 = arith.constant 0 : i32
    return %arg0, %c0_i32 : i32, i32
  }
  func.func @transform_1(%arg0: i32) -> (i32, i32) {
    %c0_i32 = arith.constant 0 : i32
    %c0_i32_0 = arith.constant 0 : i32
    %c0_i32_1 = arith.constant 0 : i32
    return %c0_i32, %c0_i32_0 : i32, i32
  }
  func.func @transform_2(%arg0: i32) -> (i32, i32) {
    %c0_i32 = arith.constant 0 : i32
    %c0_i32_0 = arith.constant 0 : i32
    %c0_i32_1 = arith.constant 0 : i32
    return %c0_i32, %c0_i32_0 : i32, i32
  }
  func.func @transform_3(%arg0: i32) -> (i32, i32) {
    %c0_i32 = arith.constant 0 : i32
    %c0_i32_0 = arith.constant 0 : i32
    %c0_i32_1 = arith.constant 0 : i32
    return %c0_i32, %c0_i32_0 : i32, i32
  }
  func.func @transform_4(%arg0: i32) -> (i32, i32) {
    %c0_i32 = arith.constant 0 : i32
    %c0_i32_0 = arith.constant 0 : i32
    %c0_i32_1 = arith.constant 0 : i32
    return %c0_i32, %c0_i32_0 : i32, i32
  }
  func.func @transform_5(%arg0: i32) -> (i32, i32) {
    %c0_i32 = arith.constant 0 : i32
    %c0_i32_0 = arith.constant 0 : i32
    return %arg0, %c0_i32 : i32, i32
  }
}

</mosaic_0001>

<bundles_post_ra>
// kernel: tpu_custom_call.1
= control target key start
LH: loop header
LB: loop body
LE: loop exit
PB: predicated region body
PF: predicated region fallthrough
CT: control target
= control target key end

     0   :  { %vm34_vm0 = vcmask 261120   ;;  %s418_s0 = inlined_call_operand.vmem [shape: f32[16,32], index: 0, kind: input, shape index: {}]   ;;  %s419_s1 = inlined_call_operand.vmem [shape: f32[32,64], index: 1, kind: input, shape index: {}]   ;;  %s420_s2 = inlined_call_operand.vmem [shape: f32[1,64], index: 2, kind: input, shape index: {}]   ;;  %s421_s3 = inlined_call_operand.vmem [shape: f32[64,32], index: 3, kind: input, shape index: {}]   ;;  %s422_s4 = inlined_call_operand.vmem [shape: f32[1,32], index: 4, kind: input, shape index: {}]   ;;  %s423_s5 = inlined_call_operand.hbm [shape: f32[16,32], index: 5, kind: output, shape index: {}]  }
   0x1   :  { %v26_v0 = vld [vmem:[%s419_s1 + $0x18] sm:$0xff]  ;;  %v25_v1 = vld [vmem:[%s419_s1 + $0x10] sm:$0xff]  ;;  %v21_v2 = vld [vmem:[%s418_s0] sm:$0xff] }
   0x2   :  { %271 = vmatprep.subr.mxu0 %v26_v0  ;;  %v24_v3 = vld [vmem:[%s419_s1 + $0x8] sm:$0xff]  ;;  %279 = vmatprep.mubr.msk.f32.mxu0 %vm34_vm0, %v21_v2 }
   0x3   :  { %272 = vmatpush3.msra.mxu0 %v26_v0 }
   0x4   :  { %10 = vsyncpa [#allocation3], 0  ;;  %273 = vmatprep.subr.mxu0 %v25_v1  ;;  %v23_v4 = vld [vmem:[%s419_s1] sm:$0xff]  ;;  %v22_v5 = vld [vmem:[%s418_s0 + $0x8] sm:$0xff]  ;;  %vm149_vm1 = vcmask 523264   ;;  %s330_s21 = smov [#allocation2]  }
   0x5   :  { %274 = vmatpush3.msra.mxu0 %v25_v1  ;;  %v141_v6 = vld [vmem:[%s421_s3 + $0x38] sm:$0xff]  ;;  %v140_v7 = vld [vmem:[%s421_s3 + $0x30] sm:$0xff]  ;;  %v139_v8 = vld [vmem:[%s421_s3 + $0x28] sm:$0xff]  ;;  %s238_s22 = sshll.u32 %s330_s21, 4  ;;  %s239_s22 = int_to_ptr.vmem [resolvable:$true] %s238_s22 }
   0x6   :  { %275 = vmatprep.subr.mxu0 %v24_v3  ;;  %282 = vmatprep.subr.mxu1 %v141_v6  ;;  %v138_v9 = vld [vmem:[%s421_s3 + $0x20] sm:$0xff]  ;;  %v137_v10 = vld [vmem:[%s421_s3 + $0x18] sm:$0xff]  ;;  %v136_v11 = vld [vmem:[%s421_s3 + $0x10] sm:$0xff]  ;;  %s308_s23 = scalar_lea.vmem %s239_s22, 256  ;;  %p313_p1 = scmp.lt.s32.totalorder %s239_s22, %s239_s22 }
   0x7   :  { %276 = vmatpush3.msra.mxu0 %v24_v3  ;;  %283 = vmatpush3.msra.mxu1 %v141_v6  ;;  %v135_v12 = vld [vmem:[%s421_s3 + $0x8] sm:$0xff]  ;;  %v134_v13 = vld [vmem:[%s421_s3] sm:$0xff]  ;;  %p309_p0 = scmp.ne.s32.totalorder %s239_s22, %s308_s23  ;;  %p314_p2 = scmp.lt.s32.totalorder %s308_s23, %s308_s23 }
   0x8   :  { %277 = vmatprep.subr.mxu0 %v23_v4  ;;  %284 = vmatprep.subr.mxu1 %v140_v7  ;;  %v249_v14 = vld [vmem:[%s420_s2] ss:$0 sm:$0xff] }
   0x9   :  { %278 = vmatpush3.msra.mxu0 %v23_v4  ;;  %285 = vmatpush3.msra.mxu1 %v140_v7  ;;  %v252_v37 = vld [vmem:[%s422_s4] ss:$0 sm:$0xff]  ;;  %p315_p3 = por %p314_p2, %p313_p1 }
   0xa   :  { %280 = vmatmul.mubr.msk.f32.vlgmr.msra.gmra.mxu0 %vm34_vm0, %v22_v5  ;;  %286 = vmatprep.subr.mxu1 %v139_v8 }
   0xb   :  { %287 = vmatpush3.msra.mxu1 %v139_v8  ;;  %p316_p4 = pnand %p315_p3, %p309_p0 }
   0xc   :  { %288 = vmatprep.subr.mxu1 %v138_v9 }
   0xd   :  { %289 = vmatpush3.msra.mxu1 %v138_v9 }
   0xe   :  { %290 = vmatprep.subr.mxu1 %v137_v10 }
   0xf   :  { %291 = vmatpush3.msra.mxu1 %v137_v10 }
  0x10   :  { %292 = vmatprep.subr.mxu1 %v136_v11 }
  0x11   :  { %293 = vmatpush3.msra.mxu1 %v136_v11 }
  0x12   :  { %294 = vmatprep.subr.mxu1 %v135_v12 }
  0x13   :  { %295 = vmatpush3.msra.mxu1 %v135_v12 }
  0x14   :  { %296 = vmatprep.subr.mxu1 %v134_v13 }
  0x15   :  { %297 = vmatpush3.msra.mxu1 %v134_v13 }
  0xca   :  { %v281_v15 = vpop.f32.mrf.mxu0 }
  0xcb   :  { %v113_v16 = vadd.f32 %v281_v15, %v249_v14 }
  0xcc   :  { %v107_v17 = vpop.f32.mrf.mxu0 }
  0xcd   :  { %v117_v18 = vmul.f32 %v113_v16, %v113_v16  ;;  %v108_v19 = vadd.f32 %v249_v14, %v107_v17 }
  0xcf   :  { %v119_v20 = vmul.f32 %v117_v18, %v113_v16  ;;  %v116_v21 = vmul.f32 %v108_v19, %v108_v19 }
  0xd1   :  { %v121_v22 = vmul.f32 0.044715, %v119_v20  ;;  %v118_v23 = vmul.f32 %v116_v21, %v108_v19 }
  0xd3   :  { %v123_v24 = vadd.f32 %v121_v22, %v113_v16  ;;  %v120_v25 = vmul.f32 0.044715, %v118_v23 }
  0xd5   :  { %v125_v26 = vmul.f32 0.7978846, %v123_v24  ;;  %v122_v27 = vadd.f32 %v120_v25, %v108_v19 }
  0xd7   :  { %304 = vtanh.f32 %v125_v26  ;;  %v124_v28 = vmul.f32 0.7978846, %v122_v27 }
  0xd9   :  { %306 = vtanh.f32 %v124_v28 }
  0xe4   :  { %v305_v29 = vpop.eup %304 }
  0xe5   :  { %v129_v30 = vadd.f32 1.0, %v305_v29 }
  0xe6   :  { %v307_v31 = vpop.eup %306 }
  0xe7   :  { %v128_v32 = vadd.f32 1.0, %v307_v31  ;;  %v131_v33 = vmul.f32 0.5, %v129_v30 }
  0xe9   :  { %v130_v34 = vmul.f32 0.5, %v128_v32  ;;  %v133_v36 = vmul.f32 %v131_v33, %v113_v16 }
  0xeb   :  { %v132_v35 = vmul.f32 %v130_v34, %v108_v19 }
  0xed   :  { %298 = vmatprep.mubr.msk.f32.mxu1 %vm149_vm1, %v132_v35 }
  0xee   :  { %299 = vmatmul.mubr.msk.f32.vlgmr.msra.gmra.mxu1 %vm149_vm1, %v133_v36 }
 0x1ae   :  { %v300_v38 = vpop.f32.mrf.mxu1 }
 0x1af   :  { %v228_v39 = vadd.f32 %v300_v38, %v252_v37 }
 0x1b0   :  { %v222_v40 = vpop.f32.mrf.mxu1 }
 0x1b1   :  { %232 = vst.msk [vmem:[#allocation2 + $0x8] sm:$0xff] %vm34_vm0, %v228_v39  ;;  %v223_v41 = vadd.f32 %v252_v37, %v222_v40 }
 0x1b3   :  { %231 = vst.msk [vmem:[#allocation2] sm:$0xff] %vm34_vm0, %v223_v41 }
 0x1b4   :  { %319 = shalt.err (!%p316_p4)
}
 0x1b5   :  { %s331_s24 = smov 128   ;;  %s332_s4 = smov 8  }
 0x1b6   :  { %244 = dma.vmem_to_hbm [thread:$0]  %s239_s22, 256, %s423_s5, [#allocation3], %s331_s24, %s331_s24, %s332_s4  }
 0x1b7   :  { %328 = dma.done.wait [#allocation3], 256  }
 0x1b8   :  { %329 = vsyncadd [#allocation3], 4294967040 }
 0x1b9   :  { %248 = vsyncpa [#allocation3], 1 }

</bundles_post_ra>
